<compile_context>
chip_gen: v5e
topology: v5e:2x2
jax: 0.10.0
libtpu: 0.0.40
codegen_flags: <defaults>
</compile_context>

<pallas_src>
import jax
import jax.numpy as jnp
from jax import lax
from jax.experimental import pallas as pl
from jax.experimental.pallas import tpu as pltpu


def _round_up(x, m):
    return (x + m - 1) // m * m


def _vmem_cap_bytes():
    try:
        return int(pltpu.get_tpu_info().vmem_capacity_bytes)
    except Exception:  # not on TPU / field unavailable
        return 64 * 1024 * 1024


def _compiler_params(semantics, footprint_bytes):
    # Explicit scoped-VMEM limit: v5e defaults to 16 MiB and v7x to 32 MiB,
    # which larger tiles would trip; keep well under v7x's 64 MiB physical.
    limit = int(min(48 * 1024 * 1024,
                    max(24 * 1024 * 1024, footprint_bytes + 8 * 1024 * 1024)))
    return pltpu.CompilerParams(dimension_semantics=semantics,
                                vmem_limit_bytes=limit)


# ----------------------------------------------------------------------------
# Fast path: whole table resident in VMEM, one-hot MXU gather.
# ----------------------------------------------------------------------------
def _embed_onehot_kernel(idx_ref, w_ref, out_ref):
    # idx_ref: (G, 1) int32, w_ref: (V, D) resident in VMEM, out_ref: (G, D).
    g = idx_ref.shape[0]
    v = w_ref.shape[0]
    iota = lax.broadcasted_iota(jnp.int32, (g, v), 1)
    onehot = (iota == idx_ref[...]).astype(w_ref.dtype)
    # HIGHEST precision for f32 tables so the one-hot selection is (near) exact.
    prec = lax.Precision.HIGHEST if w_ref.dtype == jnp.float32 else None
    rows = lax.dot_general(onehot, w_ref[...], (((1,), (0,)), ((), ())),
                           precision=prec,
                           preferred_element_type=jnp.float32)
    out_ref[...] = rows.astype(out_ref.dtype)


def _embed_vmem_table(x, idx, w, weight_scaler, N, V, D, D_pad, out_dtype,
                      table_bytes):
    if weight_scaler is not None:
        # Matches the module: weight * weight_scaler.unsqueeze(-1).  The table
        # is tiny on this path, so the wrapper-side dequant is negligible.
        table = w.astype(jnp.float32) * weight_scaler.astype(jnp.float32)[:, None]
    else:
        table = w

    group = min(128, _round_up(N, 8))
    n_groups = pl.cdiv(N, group)
    n_pad = n_groups * group
    idx2 = jnp.zeros((n_pad, 1), jnp.int32).at[:N, 0].set(idx)

    out_itemsize = jnp.dtype(out_dtype).itemsize
    footprint = 2 * table_bytes + 2 * group * (D_pad * out_itemsize + 4)
    cost = pl.CostEstimate(
        flops=2 * n_pad * V * D_pad, transcendentals=0,
        bytes_accessed=table_bytes + n_pad * (D_pad * out_itemsize + 4))

    out = pl.pallas_call(
        _embed_onehot_kernel,
        out_shape=jax.ShapeDtypeStruct((n_pad, D_pad), out_dtype),
        grid=(n_groups,),
        in_specs=[pl.BlockSpec((group, 1), lambda i: (i, 0)),
                  pl.BlockSpec((V, D_pad), lambda i: (0, 0))],   # table resident
        out_specs=pl.BlockSpec((group, D_pad), lambda i: (i, 0)),
        compiler_params=_compiler_params(("parallel",), footprint),
        cost_estimate=cost,
    )(idx2, table)
    return out[:N, :D].reshape(x.shape + (D,))


# ----------------------------------------------------------------------------
# General path: table in HBM, grouped row-gather with NSLOTS-deep prefetch.
# ----------------------------------------------------------------------------
def _make_gather_kernel(group, nslots, n_groups, vocab, quant):
    """Grouped row gather; one aggregated DMA-semaphore wait per group."""

    def start_group(w_hbm, idx_ref, row_buf, sem, grp, slot):
        base = grp * group

        def issue(g):
            pltpu.make_async_copy(
                w_hbm.at[idx_ref[base + g]],   # one (D,) embedding row in HBM
                row_buf.at[slot, g],
                sem.at[slot],                  # all rows of a group share one sem
            ).start()

        if group <= 64:
            for g in range(group):             # fully unrolled, LLO-visible
                issue(g)
        else:
            def body(g, carry):
                issue(g)
                return carry
            lax.fori_loop(0, group, body, 0, unroll=8)

    def wait_group(w_hbm, row_buf, sem, slot):
        # The wait descriptor only contributes its byte count; all `group` row
        # copies signalled sem[slot], so one wait sized (group, D) covers them.
        if group <= vocab:
            src = w_hbm.at[pl.ds(0, group)]
        else:
            src = row_buf.at[slot]             # degenerate tiny-vocab case
        pltpu.make_async_copy(src, row_buf.at[slot], sem.at[slot]).wait()

    def gather(idx_ref, w_hbm, row_buf, sem):
        t = pl.program_id(0)

        @pl.when(t == 0)                       # prime the first nslots-1 groups
        def _():
            for s in range(min(nslots - 1, n_groups)):
                start_group(w_hbm, idx_ref, row_buf, sem, s, s % nslots)

        if n_groups > nslots - 1:              # steady-state lookahead prefetch
            @pl.when(t + (nslots - 1) < n_groups)
            def _():
                grp = t + (nslots - 1)
                start_group(w_hbm, idx_ref, row_buf, sem, grp, grp % nslots)

        slot = t % nslots
        wait_group(w_hbm, row_buf, sem, slot)
        return row_buf[slot]

    if quant:
        def kernel(idx_ref, scale_ref, w_hbm, out_ref, row_buf, sem):
            rows = gather(idx_ref, w_hbm, row_buf, sem)
            out_ref[...] = rows.astype(jnp.float32) * scale_ref[...]
    else:
        def kernel(idx_ref, w_hbm, out_ref, row_buf, sem):
            rows = gather(idx_ref, w_hbm, row_buf, sem)
            out_ref[...] = rows.astype(out_ref.dtype)
    return kernel


def _embed_hbm_gather(x, idx, w, weight_scaler, N, V, D, D_pad, out_dtype,
                      w_itemsize, out_itemsize):
    quant = weight_scaler is not None

    # Deeper prefetch when rows are tiny (latency-bound small DMAs).
    nslots = 4 if D_pad * w_itemsize < 2048 else 2

    # Token-group size: amortize the ~0.35us/step grid overhead and the DMA
    # descriptor burst, bounded by a VMEM budget (row buffers + double-buffered
    # output blocks).
    target = 128 if w_itemsize <= 2 else 64
    budget = 12 * 1024 * 1024
    per_token = nslots * D_pad * w_itemsize + 2 * D_pad * out_itemsize + 8
    group = max(8, min(target, (budget // per_token) // 8 * 8))
    group = min(group, _round_up(N, 8))

    n_groups = pl.cdiv(N, group)
    n_pad = n_groups * group
    # NOTE: padded tail tokens gather row 0 and are sliced off afterwards.
    idx_pad = jnp.zeros((n_pad,), jnp.int32).at[:N].set(idx)

    kernel = _make_gather_kernel(group, nslots, n_groups, V, quant)

    blk = lambda t, idx_ref: (t, 0)
    scratch_shapes = [
        pltpu.VMEM((nslots, group, D_pad), w.dtype),   # prefetched row gather
        pltpu.SemaphoreType.DMA((nslots,)),            # one shared sem per slot
    ]
    footprint = (nslots * group * D_pad * w_itemsize
                 + 2 * group * D_pad * out_itemsize + 2 * group * 4)
    cost = pl.CostEstimate(
        flops=0, transcendentals=0,
        bytes_accessed=n_pad * D_pad * (w_itemsize + out_itemsize) + 8 * n_pad)

    if quant:
        # Per-token scales gathered outside the kernel (4 B/token) -> dense
        # (G, 1) VMEM block; keeps the f32[V] scaler table out of SMEM.
        scales = jnp.take(weight_scaler.astype(jnp.float32), idx_pad, axis=0)
        scales = scales.reshape(n_pad, 1)
        in_specs = [pl.BlockSpec((group, 1), blk),
                    pl.BlockSpec(memory_space=pl.ANY)]   # table stays in HBM
        args = (idx_pad, scales, w)
    else:
        in_specs = [pl.BlockSpec(memory_space=pl.ANY)]
        args = (idx_pad, w)

    out = pl.pallas_call(
        kernel,
        out_shape=jax.ShapeDtypeStruct((n_pad, D_pad), out_dtype),
        grid_spec=pltpu.PrefetchScalarGridSpec(
            num_scalar_prefetch=1,            # only the int32 indices in SMEM
            grid=(n_groups,),
            in_specs=in_specs,
            out_specs=pl.BlockSpec((group, D_pad), blk),
            scratch_shapes=scratch_shapes),
        compiler_params=_compiler_params(("arbitrary",), footprint),
        cost_estimate=cost,
    )(*args)
    return out[:N, :D].reshape(x.shape + (D,))


# ----------------------------------------------------------------------------
# Public wrapper.
# ----------------------------------------------------------------------------
def embedding_forward(x, weight, weight_scaler=None, *, use_vmem_table=None):
    """Pallas TPU equivalent of Embedding.forward.

    x             : integer indices, any shape.
    weight        : (V, D) float/bfloat (quant=False) or int8 (quant=True).
    weight_scaler : (V,) float32, only when quant=True.
    use_vmem_table: None -> auto-dispatch; True/False forces the path.
    returns       : x.shape + (D,); float32 when quant, weight.dtype otherwise.
    """
    V, D = weight.shape
    quant = weight_scaler is not None
    out_dtype = jnp.float32 if quant else weight.dtype
    out_itemsize = jnp.dtype(out_dtype).itemsize
    w_itemsize = jnp.dtype(weight.dtype).itemsize

    # NOTE: PyTorch raises on out-of-range indices; we clamp instead so the row
    # DMAs / one-hot selection can never fault (documented divergence).
    idx = jnp.clip(x.reshape(-1).astype(jnp.int32), 0, V - 1)
    N = int(idx.shape[0])
    if N == 0:
        return jnp.zeros(x.shape + (D,), out_dtype)

    # Lane-dense output / row buffers: pad D to a multiple of 128.
    D_pad = _round_up(D, 128)
    w = weight if D_pad == D else jnp.pad(weight, ((0, 0), (0, D_pad - D)))
    # TODO(synk): for huge non-128-aligned tables, avoid the whole-table pad by
    #   DMA-ing into a D-wide sub-slice of the padded row buffer instead.

    # Dispatch: whole-table-in-VMEM one-hot path vs HBM grouped gather.
    vmem_cap = _vmem_cap_bytes()
    resident_itemsize = 4 if quant else w_itemsize   # quant table dequantised to f32
    table_bytes = V * D_pad * resident_itemsize
    table_budget = min(8 * 1024 * 1024, vmem_cap // 6)  # conservative on v7x (64 MiB VMEM)
    fast = (table_bytes <= table_budget) and (V <= 4096)
    if use_vmem_table is not None:
        fast = bool(use_vmem_table)

    if fast:
        return _embed_vmem_table(x, idx, w, weight_scaler, N, V, D, D_pad,
                                 out_dtype, table_bytes)
    return _embed_hbm_gather(x, idx, w, weight_scaler, N, V, D, D_pad,
                             out_dtype, w_itemsize, out_itemsize)


if __name__ == "__main__":
    key = jax.random.PRNGKey(0)
    k1, k2, k3, k4, k5, k6, k7, k8 = jax.random.split(key, 8)

    # --- small vocab: whole-table-in-VMEM one-hot fast path -------------------
    V, D = 64, 128
    B, S = 2, 8
    x = jax.random.randint(k1, (B, S), 0, V, dtype=jnp.int32)
    w_f32 = jax.random.normal(k2, (V, D), dtype=jnp.float32)                             # quant=False
    w_i8 = jax.random.randint(k3, (V, D), -128, 128, dtype=jnp.int32).astype(jnp.int8)   # quant=True
    scaler = jax.random.uniform(k4, (V,), dtype=jnp.float32) * 0.1 + 0.01

    out = embedding_forward(x, w_f32)                 # quant=False, VMEM path
    out_q = embedding_forward(x, w_i8, scaler)        # quant=True,  VMEM path

    # --- larger vocab: HBM grouped-gather path (forced) -----------------------
    V2, D2 = 512, 256
    B2, S2 = 4, 128
    x2 = jax.random.randint(k5, (B2, S2), 0, V2, dtype=jnp.int32)
    w2_bf16 = jax.random.normal(k6, (V2, D2), dtype=jnp.float32).astype(jnp.bfloat16)
    w2_i8 = jax.random.randint(k7, (V2, D2), -128, 128, dtype=jnp.int32).astype(jnp.int8)
    scaler2 = jax.random.uniform(k8, (V2,), dtype=jnp.float32) * 0.1 + 0.01

    out2 = embedding_forward(x2, w2_bf16, use_vmem_table=False)           # gather path
    out2_q = embedding_forward(x2, w2_i8, scaler2, use_vmem_table=False)  # gather + quant

    jax.block_until_ready((out, out_q, out2, out2_q))

    # pure-JAX references (PyTorch F.embedding semantics)
    ref = jnp.take(w_f32, x, axis=0)
    ref_q = jnp.take(w_i8.astype(jnp.float32) * scaler[:, None], x, axis=0)
    ref2 = jnp.take(w2_bf16, x2, axis=0)
    ref2_q = jnp.take(w2_i8.astype(jnp.float32) * scaler2[:, None], x2, axis=0)

    assert out.shape == (B, S, D) and out_q.shape == (B, S, D)
    assert out2.shape == (B2, S2, D2) and out2_q.shape == (B2, S2, D2)
    assert jnp.allclose(out, ref, rtol=1e-5, atol=1e-5), "non-quant (VMEM path) mismatch"
    assert jnp.allclose(out_q, ref_q, rtol=1e-5, atol=1e-4), "quant (VMEM path) mismatch"
    assert jnp.allclose(out2.astype(jnp.float32), ref2.astype(jnp.float32),
                        rtol=1e-6, atol=1e-6), "non-quant (gather path) mismatch"
    assert jnp.allclose(out2_q, ref2_q, rtol=1e-6, atol=1e-6), "quant (gather path) mismatch"

    print("KERNEL_OK")
</pallas_src>

<mosaic_0001>
module attributes {stable_mosaic.version = 11 : i64} {
  func.func @_embed_onehot_kernel(%arg0: i32, %arg1: memref<16x1xi32, #tpu.memory_space<vmem>>, %arg2: memref<64x128xf32, #tpu.memory_space<vmem>>, %arg3: memref<16x128xf32, #tpu.memory_space<vmem>>) attributes {dimension_semantics = [#tpu.dimension_semantics<parallel>], iteration_bounds = array<i64: 1>, scalar_prefetch = 0 : i64, scratch_operands = 0 : i64, tpu.core_type = #tpu.core_type<tc>, window_params = [{transform_indices = @transform_0, window_bounds = array<i64: 16, 1>}, {pipeline_mode = #tpu.pipeline_mode<synchronous>, transform_indices = @transform_1, window_bounds = array<i64: 64, 128>}, {transform_indices = @transform_2, window_bounds = array<i64: 16, 128>}]} {
    %0 = tpu.iota {dimensions = array<i32: 1>} : vector<16x64xi32>
    %c0 = arith.constant 0 : index
    %c0_0 = arith.constant 0 : index
    %1 = vector.load %arg1[%c0, %c0_0] : memref<16x1xi32, #tpu.memory_space<vmem>>, vector<16x1xi32>
    %2 = vector.broadcast %1 : vector<16x1xi32> to vector<16x64xi32>
    %3 = arith.cmpi eq, %0, %2 : vector<16x64xi32>
    %4 = arith.extui %3 : vector<16x64xi1> to vector<16x64xi32>
    %5 = arith.sitofp %4 : vector<16x64xi32> to vector<16x64xf32>
    %c0_1 = arith.constant 0 : index
    %c0_2 = arith.constant 0 : index
    %6 = vector.load %arg2[%c0_1, %c0_2] : memref<64x128xf32, #tpu.memory_space<vmem>>, vector<64x128xf32>
    %cst = arith.constant dense<0.000000e+00> : vector<16x128xf32>
    %7 = tpu.matmul %5, %6, %cst {dimension_numbers = #tpu.dot_dimension_numbers<[1], [0], [0], [1], [0, 0, 1, 1], [], []>, precision = #tpu.contract_precision<fp32>} : vector<16x64xf32>, vector<64x128xf32>, vector<16x128xf32> -> vector<16x128xf32>
    %c0_3 = arith.constant 0 : index
    %c0_4 = arith.constant 0 : index
    %8 = vector.load %arg3[%c0_3, %c0_4] : memref<16x128xf32, #tpu.memory_space<vmem>>, vector<16x128xf32>
    tpu.vector_store %arg3[%c0_3, %c0_4], %7 {strides = array<i32>} : memref<16x128xf32, #tpu.memory_space<vmem>>, vector<16x128xf32>,
    return
  }
  func.func @transform_0(%arg0: i32) -> (i32, i32) {
    %c0_i32 = arith.constant 0 : i32
    %c0_i32_0 = arith.constant 0 : i32
    return %arg0, %c0_i32 : i32, i32
  }
  func.func @transform_1(%arg0: i32) -> (i32, i32) {
    %c0_i32 = arith.constant 0 : i32
    %c0_i32_0 = arith.constant 0 : i32
    %c0_i32_1 = arith.constant 0 : i32
    return %c0_i32, %c0_i32_0 : i32, i32
  }
  func.func @transform_2(%arg0: i32) -> (i32, i32) {
    %c0_i32 = arith.constant 0 : i32
    %c0_i32_0 = arith.constant 0 : i32
    return %arg0, %c0_i32 : i32, i32
  }
}

</mosaic_0001>

<bundles_post_ra>
// kernel: tpu_custom_call.1
= control target key start
LH: loop header
LB: loop body
LE: loop exit
PB: predicated region body
PF: predicated region fallthrough
CT: control target
= control target key end

     0   :  { %7 = vsyncpa [#allocation3], 0  ;;  %s537_s0 = inlined_call_operand.vmem [shape: s32[16,1], index: 0, kind: input, shape index: {}]   ;;  %s538_s1 = inlined_call_operand.hbm [shape: f32[64,128], index: 1, kind: input, shape index: {}]   ;;  %s539_s2 = inlined_call_operand.hbm [shape: f32[16,128], index: 2, kind: output, shape index: {}]  }
   0x1   :  { %8 = vsyncpa [#allocation4], 0  ;;  %s15_s11 = sshll.u32 %s538_s1, 4  ;;  %s431_s12 = smov [#allocation2]   ;;  %s16_s11 = int_to_ptr.hbm [resolvable:$true] %s15_s11 }
   0x2   :  { %s17_s13 = sshll.u32 %s431_s12, 4  ;;  %s432_s14 = smov 128   ;;  %s18_s13 = int_to_ptr.vmem [resolvable:$true] %s17_s13 }
   0x3   :  { %s433_s15 = smov 8  }
   0x4   :  { %23 = dma.hbm_to_vmem [thread:$0]  %s16_s11, 1024, %s18_s13, [#allocation3], %s432_s14, %s432_s14, %s433_s15  }
   0x5   :  { %427 = dma.done.wait [#allocation3], 1024  }
   0x6   :  { %428 = vsyncadd [#allocation3], 4294966272  ;;  %v434_v0 = vmov 0   ;;  %v30_v1 = vld [vmem:[%s537_s0] sm:$0xff]  ;;  %v51_v2 = vld [vmem:[#allocation2 + $0x38] sm:$0xff]  ;;  %v28_v51 = vlaneseq  ;;  %vm52_vm0 = vcmask 523264  }
   0x7   :  { %378 = vset.pattern.permute.xlu0 %v434_v0  ;;  %v461_v3 = vand.u32 4294901760, %v51_v2  ;;  %v50_v4 = vld [vmem:[#allocation2 + $0x30] sm:$0xff]  ;;  %v49_v5 = vld [vmem:[#allocation2 + $0x28] sm:$0xff]  ;;  %v48_v6 = vld [vmem:[#allocation2 + $0x20] sm:$0xff]  ;;  %v435_v54 = vmov 0.0   ;;  %s335_s22 = sshll.u32 %s539_s2, 4  ;;  %s336_s22 = int_to_ptr.hbm [resolvable:$true] %s335_s22 }
   0x8   :  { %33 = vperm.xlu0 %378, %v30_v1   ;;  %v463_v7 = vand.u32 4294901760, %v50_v4  ;;  %v465_v8 = vand.u32 4294901760, %v49_v5  ;;  %v467_v9 = vand.u32 4294901760, %v48_v6  ;;  %v47_v10 = vld [vmem:[#allocation2 + $0x18] sm:$0xff]  ;;  %v46_v11 = vld [vmem:[#allocation2 + $0x10] sm:$0xff]  ;;  %v45_v12 = vld [vmem:[#allocation2 + $0x8] sm:$0xff] }
   0x9   :  { %v109_v13 = vsub.f32 %v51_v2, %v461_v3  ;;  %217 = vmatpush.msra.mxu3 %v461_v3  ;;  %v471_v14 = vand.u32 4294901760, %v47_v10  ;;  %68 = vmatpush.msra.mxu0 %v461_v3  ;;  %v474_v15 = vand.u32 4294901760, %v46_v11  ;;  %v476_v16 = vand.u32 4294901760, %v45_v12  ;;  %v31_v23 = vld [vmem:[%s537_s0 + $0x8] sm:$0xff]  ;;  %v44_v45 = vld [vmem:[#allocation2] sm:$0xff]  ;;  %s436_s0 = smov [#allocation5]  }
   0xa   :  { %v115_v17 = vsub.f32 %v50_v4, %v463_v7  ;;  %v121_v18 = vsub.f32 %v49_v5, %v465_v8  ;;  %v127_v19 = vsub.f32 %v48_v6, %v467_v9  ;;  %v81_v46 = vand.u32 4294901760, %v44_v45  ;;  %s333_s19 = sshll.u32 %s436_s0, 4  ;;  %s334_s19 = int_to_ptr.vmem [resolvable:$true] %s333_s19 }
   0xb   :  { %v110_v20 = vand.u32 4294901760, %v109_v13  ;;  %175 = vmatpush.msra.mxu2 %v109_v13  ;;  %219 = vmatpush.msra.mxu3 %v463_v7  ;;  %v133_v21 = vsub.f32 %v47_v10, %v471_v14  ;;  %v139_v22 = vsub.f32 %v46_v11, %v474_v15  ;;  %v145_v29 = vsub.f32 %v45_v12, %v476_v16 }
   0xc   :  { %v116_v24 = vand.u32 4294901760, %v115_v17  ;;  %v122_v25 = vand.u32 4294901760, %v121_v18  ;;  %v487_v26 = vand.u32 4294901760, %v127_v19  ;;  %70 = vmatpush.msra.mxu0 %v463_v7  ;;  %v151_v47 = vsub.f32 %v44_v45, %v81_v46 }
   0xd   :  { %v111_v27 = vsub.f32 %v109_v13, %v110_v20  ;;  %178 = vmatpush.msra.mxu2 %v115_v17  ;;  %v490_v28 = vand.u32 4294901760, %v133_v21  ;;  %221 = vmatpush.msra.mxu3 %v465_v8  ;;  %v140_v34 = vand.u32 4294901760, %v139_v22  ;;  %v146_v38 = vand.u32 4294901760, %v145_v29 }
   0xe   :  { %v117_v30 = vsub.f32 %v115_v17, %v116_v24  ;;  %v123_v31 = vsub.f32 %v121_v18, %v122_v25  ;;  %72 = vmatpush.msra.mxu0 %v465_v8  ;;  %v129_v33 = vsub.f32 %v127_v19, %v487_v26  ;;  %v152_v48 = vand.u32 4294901760, %v151_v47 }
   0xf   :  { %v112_v32 = vand.u32 4294901760, %v111_v27  ;;  %181 = vmatpush.msra.mxu2 %v121_v18  ;;  %223 = vmatpush.msra.mxu3 %v467_v9  ;;  %v135_v37 = vsub.f32 %v133_v21, %v490_v28  ;;  %v141_v40 = vsub.f32 %v139_v22, %v140_v34  ;;  %v147_v42 = vsub.f32 %v145_v29, %v146_v38 }
  0x10   :  { %36 = vperm.xlu0 %378, %v31_v23   ;;  %v118_v35 = vand.u32 4294901760, %v117_v30  ;;  %74 = vmatpush.msra.mxu0 %v467_v9  ;;  %v124_v36 = vand.u32 4294901760, %v123_v31  ;;  %v130_v39 = vand.u32 4294901760, %v129_v33  ;;  %v153_v49 = vsub.f32 %v151_v47, %v152_v48 }
  0x11   :  { %113 = vmatpush.msra.mxu1 %v112_v32  ;;  %184 = vmatpush.msra.mxu2 %v127_v19  ;;  %v136_v41 = vand.u32 4294901760, %v135_v37  ;;  %v142_v43 = vand.u32 4294901760, %v141_v40  ;;  %v148_v44 = vand.u32 4294901760, %v147_v42  ;;  %v29_v52 = vand.u32 127, %v28_v51 }
  0x12   :  { %225 = vmatpush.msra.mxu3 %v471_v14  ;;  %76 = vmatpush.msra.mxu0 %v471_v14  ;;  %v154_v50 = vand.u32 4294901760, %v153_v49 }
  0x13   :  { %119 = vmatpush.msra.mxu1 %v118_v35  ;;  %187 = vmatpush.msra.mxu2 %v133_v21 }
  0x14   :  { %227 = vmatpush.msra.mxu3 %v474_v15  ;;  %78 = vmatpush.msra.mxu0 %v474_v15 }
  0x15   :  { %125 = vmatpush.msra.mxu1 %v124_v36  ;;  %190 = vmatpush.msra.mxu2 %v139_v22 }
  0x16   :  { %229 = vmatpush.msra.mxu3 %v476_v16  ;;  %80 = vmatpush.msra.mxu0 %v476_v16 }
  0x17   :  { %131 = vmatpush.msra.mxu1 %v130_v39  ;;  %193 = vmatpush.msra.mxu2 %v145_v29 }
  0x18   :  { %231 = vmatpush.msra.mxu3 %v81_v46  ;;  %82 = vmatpush.msra.mxu0 %v81_v46 }
  0x19   :  { %137 = vmatpush.msra.mxu1 %v136_v41  ;;  %196 = vmatpush.msra.mxu2 %v151_v47 }
  0x1a   :  { %364 = vmatpush.msrb.mxu3 %v461_v3  ;;  %256 = vmatpush.msrb.mxu0 %v110_v20 }
  0x1b   :  { %143 = vmatpush.msra.mxu1 %v142_v43  ;;  %356 = vmatpush.msrb.mxu2 %v110_v20 }
  0x1c   :  { %365 = vmatpush.msrb.mxu3 %v463_v7  ;;  %260 = vmatpush.msrb.mxu0 %v116_v24 }
  0x1d   :  { %149 = vmatpush.msra.mxu1 %v148_v44  ;;  %357 = vmatpush.msrb.mxu2 %v116_v24 }
  0x1e   :  { %366 = vmatpush.msrb.mxu3 %v465_v8  ;;  %264 = vmatpush.msrb.mxu0 %v122_v25 }
  0x1f   :  { %358 = vmatpush.msrb.mxu2 %v122_v25  ;;  %155 = vmatpush.msra.mxu1 %v154_v50 }
  0x20   :  { %367 = vmatpush.msrb.mxu3 %v467_v9  ;;  %268 = vmatpush.msrb.mxu0 %v487_v26 }
  0x21   :  { %303 = vmatpush.msrb.mxu1 %v461_v3  ;;  %359 = vmatpush.msrb.mxu2 %v487_v26 }
  0x22   :  { %368 = vmatpush.msrb.mxu3 %v471_v14  ;;  %272 = vmatpush.msrb.mxu0 %v490_v28 }
  0x23   :  { %305 = vmatpush.msrb.mxu1 %v463_v7  ;;  %360 = vmatpush.msrb.mxu2 %v490_v28 }
  0x24   :  { %369 = vmatpush.msrb.mxu3 %v474_v15  ;;  %276 = vmatpush.msrb.mxu0 %v140_v34 }
  0x25   :  { %307 = vmatpush.msrb.mxu1 %v465_v8  ;;  %361 = vmatpush.msrb.mxu2 %v140_v34 }
  0x26   :  { %370 = vmatpush.msrb.mxu3 %v476_v16  ;;  %280 = vmatpush.msrb.mxu0 %v146_v38 }
  0x27   :  { %309 = vmatpush.msrb.mxu1 %v467_v9  ;;  %362 = vmatpush.msrb.mxu2 %v146_v38 }
  0x28   :  { %371 = vmatpush.msrb.mxu3 %v81_v46  ;;  %284 = vmatpush.msrb.mxu0 %v152_v48 }
  0x29   :  { %311 = vmatpush.msrb.mxu1 %v471_v14  ;;  %363 = vmatpush.msrb.mxu2 %v152_v48 }
  0x2b   :  { %313 = vmatpush.msrb.mxu1 %v474_v15 }
  0x2d   :  { %315 = vmatpush.msrb.mxu1 %v476_v16 }
  0x2f   :  { %317 = vmatpush.msrb.mxu1 %v81_v46 }
  0x7a   :  { %v34_v53 = vpop.permute.xlu0 %33 }
  0x7b   :  { %vm38_vm1 = vcmp.eq.s32.totalorder %v29_v52, %v34_v53 }
  0x7c   :  { %v348_v55 = vsel %vm38_vm1, 1.0, %v435_v54 }
  0x7d   :  { %350 = vmatmul.msk.f32.vlgmr.msra.gmra.mxu1 %vm52_vm0, %v348_v55  ;;  %v54_v56 = vsel %vm52_vm0, %v348_v55, 0 }
  0x7e   :  { %v84_v57 = vsub.f32 %v54_v56, %v54_v56 }
  0x80   :  { %199 = vmatmul.f32.vlgmr.msra.gmra.mxu2 %v84_v57  ;;  %v85_v58 = vand.u32 4294901760, %v84_v57 }
  0x82   :  { %235 = vmatmul.f32.vlgmr.msra.gmra.mxu3 %v85_v58  ;;  %v37_v59 = vpop.permute.xlu0 %36  ;;  %v86_v60 = vsub.f32 %v84_v57, %v85_v58 }
  0x83   :  { %vm39_vm2 = vcmp.eq.s32.totalorder %v29_v52, %v37_v59 }
  0x84   :  { %v349_v61 = vsel %vm39_vm2, 1.0, %v435_v54  ;;  %v87_v62 = vand.u32 4294901760, %v86_v60 }
  0x85   :  { %351 = vmatmul.msk.f32.gmra.mxu1 %vm52_vm0, %v349_v61  ;;  %v57_v63 = vsel %vm52_vm0, %v349_v61, 0 }
  0x86   :  { %88 = vmatmul.f32.vlgmr.msra.gmra.mxu0 %v87_v62  ;;  %v92_v0 = vsub.f32 %v57_v63, %v57_v63 }
  0x88   :  { %204 = vmatmul.f32.gmra.mxu2 %v92_v0  ;;  %v93_v1 = vand.u32 4294901760, %v92_v0 }
  0x8a   :  { %241 = vmatmul.f32.gmra.mxu3 %v93_v1  ;;  %v94_v2 = vsub.f32 %v92_v0, %v93_v1 }
  0x8c   :  { %v95_v3 = vand.u32 4294901760, %v94_v2 }
  0x8d   :  { %354 = vmatmul.msk.f32.vlgmr.msrb.gmra.mxu1 %vm52_vm0, %v348_v55 }
  0x8e   :  { %96 = vmatmul.f32.gmra.mxu0 %v95_v3 }
  0x90   :  { %353 = vmatmul.msk.f32.vlgmr.msrb.gmra.mxu2 %vm52_vm0, %v349_v61 }
  0x92   :  { %355 = vmatmul.msk.f32.vlgmr.msrb.gmra.mxu3 %vm52_vm0, %v349_v61 }
  0x96   :  { %352 = vmatmul.msk.f32.vlgmr.msrb.gmra.mxu0 %vm52_vm0, %v348_v55 }
  0xfa   :  { %v158_v4 = vpop.f32.mrf.mxu1 }
 0x102   :  { %v162_v8 = vpop.f32.mrf.mxu1 }
 0x103   :  { %v89_v5 = vpop.f32.mrf.mxu0  ;;  %v200_v6 = vpop.f32.mrf.mxu2 }
 0x104   :  { %v159_v9 = vadd.f32 %v158_v4, %v89_v5 }
 0x105   :  { %v236_v7 = vpop.f32.mrf.mxu3 }
 0x106   :  { %v201_v14 = vadd.f32 %v200_v6, %v159_v9 }
 0x108   :  { %v237_v16 = vadd.f32 %v236_v7, %v201_v14 }
 0x10a   :  { %v320_v22 = vpop.f32.mrf.mxu1 }
 0x10b   :  { %v97_v10 = vpop.f32.mrf.mxu0  ;;  %v205_v11 = vpop.f32.mrf.mxu2 }
 0x10c   :  { %v163_v12 = vadd.f32 %v162_v8, %v97_v10 }
 0x10d   :  { %v242_v13 = vpop.f32.mrf.mxu3 }
 0x10e   :  { %v206_v15 = vadd.f32 %v205_v11, %v163_v12 }
 0x110   :  { %v243_v17 = vadd.f32 %v242_v13, %v206_v15 }
 0x113   :  { %v287_v18 = vpop.f32.mrf.mxu0  ;;  %v291_v19 = vpop.f32.mrf.mxu2 }
 0x114   :  { %v288_v20 = vadd.f32 %v287_v18, %v237_v16  ;;  %v292_v21 = vadd.f32 %v291_v19, %v243_v17 }
 0x115   :  { %v324_v23 = vpop.f32.mrf.mxu3 }
 0x116   :  { %v321_v24 = vadd.f32 %v320_v22, %v288_v20  ;;  %v325_v25 = vadd.f32 %v324_v23, %v292_v21 }
 0x118   :  { %327 = vst [vmem:[#allocation5] sm:$0xff] %v321_v24 }
 0x119   :  { %328 = vst [vmem:[#allocation5 + $0x8] sm:$0xff] %v325_v25 }
 0x11a   :  { %341 = dma.vmem_to_hbm [thread:$0]  %s334_s19, 256, %s336_s22, [#allocation4], %s432_s14, %s432_s14, %s433_s15  }
 0x11b   :  { %429 = dma.done.wait [#allocation4], 256  }
 0x11c   :  { %430 = vsyncadd [#allocation4], 4294967040 }
 0x11d   :  { %346 = vsyncpa [#allocation3], 1 }
 0x11e   :  { %347 = vsyncpa [#allocation4], 1 }

</bundles_post_ra>
